<compile_context>
chip_gen: v7x
topology: tpu7x:2x2x1
jax: 0.10.0
libtpu: 0.0.40
codegen_flags: <defaults>
</compile_context>

<pallas_src>
import math

import jax
import jax.numpy as jnp
import numpy as np
from jax.experimental import pallas as pl
from jax.experimental.pallas import tpu as pltpu

TWO_PI = 2.0 * math.pi
HALF_PI = 0.5 * math.pi


def _time_encode_kernel(t_ref, wcat_ref, offs_ref, o_ref):
    """out = sin(t * [w|w] + [0|pi/2]) -- one full-width transcendental.

    t_ref:    (tile, r)      f32  r timestamps packed per output row
    wcat_ref: (1, dim)       f32  [2*pi*freqs | 2*pi*freqs]
    offs_ref: (1, dim)       f32  [0,...,0 | pi/2,...,pi/2]
    o_ref:    (tile, r*dim)       [sin|cos]_0 | [sin|cos]_1 | ...
    """
    wcat = wcat_ref[...]          # hoisted: broadcast once, reused r times
    offs = offs_ref[...]
    t = t_ref[...]
    r = t.shape[-1]               # static
    if r == 1:
        phase = t * wcat + offs
    else:
        phase = jnp.concatenate(
            [t[:, k:k + 1] * wcat + offs for k in range(r)], axis=-1)
    o_ref[...] = jnp.sin(phase).astype(o_ref.dtype)


def _round_up(x, m):
    return ((x + m - 1) // m) * m


def _cdiv(a, b):
    return (a + b - 1) // b


def _pick_tile_rows(n_rows, lane_w, out_bytes, budget_bytes):
    """Largest multiple-of-8 row tile whose *double-buffered* footprint fits.

    Per row: output block = lane_w * out_bytes; the t block is (tile, r) f32
    but lives on (8,128) VMEM tiles, i.e. 128 lanes * 4 B = 512 B per row
    regardless of r.  Both are double-buffered by the pipeline.
    """
    per_row = 2 * (lane_w * out_bytes + 128 * 4)
    tile = max(8, (budget_bytes // per_row) // 8 * 8)
    tile = min(tile, _round_up(max(n_rows, 1), 8))   # don't allocate past n_rows
    if n_rows > 8:
        # v7x megacore: keep >= 2 grid steps so "parallel" can use both TCs.
        tile = min(tile, _round_up(_cdiv(n_rows, 2), 8))
    return max(8, tile)


def time_encode(t, freqs, *, out_dtype=jnp.float32, tile_bytes=2 << 20):
    """Pallas TimeEncode. t: any shape, freqs: (dim//2,). Returns (*t.shape, dim)."""
    half = int(freqs.shape[0])
    dim = 2 * half
    orig_shape = t.shape
    n = int(np.prod(orig_shape)) if orig_shape else 1

    # Fold 2*pi once; fold cos into sin with a +pi/2 phase offset.
    w = freqs.astype(jnp.float32) * TWO_PI
    wcat = jnp.concatenate([w, w]).reshape(1, dim)
    offs = jnp.concatenate(
        [jnp.zeros((half,), jnp.float32),
         jnp.full((half,), HALF_PI, jnp.float32)]).reshape(1, dim)

    # Lane-dense packing: r rows of width dim -> lane width r*dim (mult of 128).
    r = math.lcm(dim, 128) // dim
    if r > 8:
        r = 1                      # tiny/awkward dims: plain one-row-per-row path
    n_pad = _round_up(n, r)
    lane_w = r * dim
    n_rows = n_pad // r

    t_flat = t.reshape(-1).astype(jnp.float32)
    if n_pad != n:
        t_flat = jnp.pad(t_flat, (0, n_pad - n))
    t2 = t_flat.reshape(n_rows, r)

    out_bytes = np.dtype(out_dtype).itemsize
    tile = _pick_tile_rows(n_rows, lane_w, out_bytes, tile_bytes)
    grid = (_cdiv(n_rows, tile),)   # ragged last block masked by Pallas

    out = pl.pallas_call(
        _time_encode_kernel,
        out_shape=jax.ShapeDtypeStruct((n_rows, lane_w), out_dtype),
        grid_spec=pltpu.PrefetchScalarGridSpec(
            num_scalar_prefetch=0,
            grid=grid,
            in_specs=[
                pl.BlockSpec((tile, r), lambda i: (i, 0)),    # timestamps
                pl.BlockSpec((1, dim), lambda i: (0, 0)),     # [w | w]
                pl.BlockSpec((1, dim), lambda i: (0, 0)),     # [0 | pi/2]
            ],
            out_specs=pl.BlockSpec((tile, lane_w), lambda i: (i, 0)),
        ),
        compiler_params=pltpu.CompilerParams(
            dimension_semantics=("parallel",)),   # v7x: shard tiles over 2 TCs
    )(t2, wcat, offs)

    out = out.reshape(n_pad, dim)
    if n_pad != n:
        out = out[:n]
    return out.reshape(*orig_shape, dim)


def time_encode_ref(t, freqs):
    # Same 2*pi association as the kernel; uses true cos (kernel uses
    # sin(x + pi/2), identical up to f32 rounding of the phase).
    w = freqs.astype(jnp.float32) * TWO_PI
    phase = t[..., None].astype(jnp.float32) * w
    return jnp.concatenate([jnp.sin(phase), jnp.cos(phase)], axis=-1)


if __name__ == "__main__":
    key = jax.random.PRNGKey(0)
    k_f, k_t, k_f2, k_t2, k_f3, k_t3 = jax.random.split(key, 6)

    # --- main check: dim=64 -> packed r=2, lane width 128 ---
    dim = 64
    batch, seq = 2, 64
    freqs = jax.random.normal(k_f, (dim // 2,), dtype=jnp.float32)
    t = jax.random.uniform(k_t, (batch, seq), dtype=jnp.float32) * 10.0
    out = jax.block_until_ready(time_encode(t, freqs))
    ref = time_encode_ref(t, freqs)
    assert out.shape == (batch, seq, dim)
    np.testing.assert_allclose(np.asarray(out), np.asarray(ref),
                               rtol=1e-4, atol=2e-4)

    # --- dim=96 -> lcm packing r=4, lane width 384 (was masked-store fallback) ---
    dim2 = 96
    freqs2 = jax.random.normal(k_f2, (dim2 // 2,), dtype=jnp.float32)
    t2 = jax.random.uniform(k_t2, (2, 12), dtype=jnp.float32) * 10.0
    out2 = jax.block_until_ready(time_encode(t2, freqs2))
    ref2 = time_encode_ref(t2, freqs2)
    assert out2.shape == (2, 12, dim2)
    np.testing.assert_allclose(np.asarray(out2), np.asarray(ref2),
                               rtol=1e-4, atol=2e-4)

    # --- dim=128, ragged 1-D t -> r=1 path, single full-width sin ---
    dim3 = 128
    freqs3 = jax.random.normal(k_f3, (dim3 // 2,), dtype=jnp.float32)
    t3 = jax.random.uniform(k_t3, (5,), dtype=jnp.float32) * 10.0
    out3 = jax.block_until_ready(time_encode(t3, freqs3))
    ref3 = time_encode_ref(t3, freqs3)
    assert out3.shape == (5, dim3)
    np.testing.assert_allclose(np.asarray(out3), np.asarray(ref3),
                               rtol=1e-4, atol=2e-4)

    print("KERNEL_OK")
</pallas_src>

<mosaic_0001>
module attributes {stable_mosaic.version = 11 : i64} {
  func.func @_time_encode_kernel(%arg0: i32, %arg1: memref<32x2xf32, #tpu.memory_space<vmem>>, %arg2: memref<1x64xf32, #tpu.memory_space<vmem>>, %arg3: memref<1x64xf32, #tpu.memory_space<vmem>>, %arg4: memref<32x128xf32, #tpu.memory_space<vmem>>) attributes {dimension_semantics = [#tpu.dimension_semantics<parallel>], iteration_bounds = array<i64: 2>, scalar_prefetch = 0 : i64, scratch_operands = 0 : i64, tpu.core_type = #tpu.core_type<tc>, window_params = [{transform_indices = @transform_0, window_bounds = array<i64: 32, 2>}, {pipeline_mode = #tpu.pipeline_mode<synchronous>, transform_indices = @transform_1, window_bounds = array<i64: 1, 64>}, {pipeline_mode = #tpu.pipeline_mode<synchronous>, transform_indices = @transform_2, window_bounds = array<i64: 1, 64>}, {transform_indices = @transform_3, window_bounds = array<i64: 32, 128>}]} {
    %c0 = arith.constant 0 : index
    %c0_0 = arith.constant 0 : index
    %0 = vector.load %arg2[%c0, %c0_0] : memref<1x64xf32, #tpu.memory_space<vmem>>, vector<1x64xf32>
    %c0_1 = arith.constant 0 : index
    %c0_2 = arith.constant 0 : index
    %1 = vector.load %arg3[%c0_1, %c0_2] : memref<1x64xf32, #tpu.memory_space<vmem>>, vector<1x64xf32>
    %c0_3 = arith.constant 0 : index
    %c0_4 = arith.constant 0 : index
    %2 = vector.load %arg1[%c0_3, %c0_4] : memref<32x2xf32, #tpu.memory_space<vmem>>, vector<32x2xf32>
    %3 = vector.extract_strided_slice %2 {offsets = [0, 0], sizes = [32, 1], strides = [1, 1]} : vector<32x2xf32> to vector<32x1xf32>
    %4 = vector.broadcast %3 : vector<32x1xf32> to vector<32x64xf32>
    %5 = vector.broadcast %0 : vector<1x64xf32> to vector<32x64xf32>
    %6 = arith.mulf %4, %5 : vector<32x64xf32>
    %7 = vector.broadcast %1 : vector<1x64xf32> to vector<32x64xf32>
    %8 = arith.addf %6, %7 : vector<32x64xf32>
    %9 = vector.extract_strided_slice %2 {offsets = [0, 1], sizes = [32, 1], strides = [1, 1]} : vector<32x2xf32> to vector<32x1xf32>
    %10 = vector.broadcast %9 : vector<32x1xf32> to vector<32x64xf32>
    %11 = vector.broadcast %0 : vector<1x64xf32> to vector<32x64xf32>
    %12 = arith.mulf %10, %11 : vector<32x64xf32>
    %13 = vector.broadcast %1 : vector<1x64xf32> to vector<32x64xf32>
    %14 = arith.addf %12, %13 : vector<32x64xf32>
    %15 = tpu.concatenate %8, %14 in 1 : vector<32x64xf32>, vector<32x64xf32> -> vector<32x128xf32>
    %16 = math.sin %15 : vector<32x128xf32>
    %c0_5 = arith.constant 0 : index
    %c0_6 = arith.constant 0 : index
    %17 = vector.load %arg4[%c0_5, %c0_6] : memref<32x128xf32, #tpu.memory_space<vmem>>, vector<32x128xf32>
    tpu.vector_store %arg4[%c0_5, %c0_6], %16 {strides = array<i32>} : memref<32x128xf32, #tpu.memory_space<vmem>>, vector<32x128xf32>,
    return
  }
  func.func @transform_0(%arg0: i32) -> (i32, i32) {
    %c0_i32 = arith.constant 0 : i32
    %c0_i32_0 = arith.constant 0 : i32
    return %arg0, %c0_i32 : i32, i32
  }
  func.func @transform_1(%arg0: i32) -> (i32, i32) {
    %c0_i32 = arith.constant 0 : i32
    %c0_i32_0 = arith.constant 0 : i32
    %c0_i32_1 = arith.constant 0 : i32
    return %c0_i32, %c0_i32_0 : i32, i32
  }
  func.func @transform_2(%arg0: i32) -> (i32, i32) {
    %c0_i32 = arith.constant 0 : i32
    %c0_i32_0 = arith.constant 0 : i32
    %c0_i32_1 = arith.constant 0 : i32
    return %c0_i32, %c0_i32_0 : i32, i32
  }
  func.func @transform_3(%arg0: i32) -> (i32, i32) {
    %c0_i32 = arith.constant 0 : i32
    %c0_i32_0 = arith.constant 0 : i32
    return %arg0, %c0_i32 : i32, i32
  }
}

</mosaic_0001>

<bundles_post_ra>
// kernel: tpu_custom_call.1
= control target key start
LH: loop header
LB: loop body
LE: loop exit
PB: predicated region body
PF: predicated region fallthrough
CT: control target
= control target key end

     0   :  { %8 = vsyncpa [#allocation3], 0  ;;  %s1393_s0 = inlined_call_operand.vmem [shape: f32[64,2], index: 0, kind: input, shape index: {}]   ;;  %s1394_s1 = inlined_call_operand.vmem [shape: f32[1,64], index: 1, kind: input, shape index: {}]   ;;  %s1395_s2 = inlined_call_operand.vmem [shape: f32[1,64], index: 2, kind: input, shape index: {}]   ;;  %s1396_s3 = inlined_call_operand.hbm [shape: f32[64,128], index: 3, kind: output, shape index: {}]  }
   0x1   :  { %10 = vsyncpa [#allocation3 + $0x1], 0  ;;  %s973_s12 = smov 0   ;;  %s975_s13 = smov 0  }
   0x2   :  { %s977_s14 = smov 0   ;;  %s979_s15 = smov 0  }
   0x3 LB: > { %s994_s16 = sadd.s32 4294967295, %s939_s15   ;;  %s759_s17 = sadd.s32 4294967294, %s939_s15   ;;  %s939_s15 = sphi %s979_s15, %s1406_s15   ;;  %s935_s14 = sphi %s977_s14, %s1405_s14   ;;  %s931_s13 = sphi %s975_s13, %s1404_s13   ;;  %s927_s12 = sphi %s973_s12, %s1403_s12  }
   0x4   : > { %s998_s18 = sadd.s32 1, %s939_s15   ;;  %s91_s19 = sadd.s32 1, %s935_s14 }
   0x5   : > { %s88_s20 = ssub.s32 %s939_s15, %s998_s18  ;;  %p101_p0 = scmp.ne.s32.totalorder %s935_s14, %s931_s13 }
   0x6   : > { %p89_p1 = scmp.eq.s32.totalorder %s88_s20, 0  ;;  %p102_p2 = scmp.eq.s32.totalorder %s994_s16, 1 }
   0x7   : > { %p107_p3 = scmp.ne.s32.totalorder %s931_s13, %s927_s12  ;;  %p108_p4 = scmp.eq.s32.totalorder %s759_s17, 1 }
   0x8   : > { %s1009_s21 = scalar_select %p89_p1, %s935_s14, %s91_s19  }
   0x9   : > { %p1011_p5 = por %p102_p2, %p101_p0  ;;  %p1015_p6 = por %p108_p4, %p107_p3 }
   0xa   : > { %p762_p7 = scmp.ge.s32.totalorder %s939_s15, 1  ;;  %p141_p8 = scmp.lt.s32.totalorder %s939_s15, 3 }
   0xc   : > { %p142_p9 = pnand %p762_p7, %p141_p8 }
   0xd   : > { %s764_s24 = sshll.u32 (!%p142_p9), %s994_s16, 2  ;;  %v941_v0 = vmov (!%p142_p9), 1   ;;  %v942_v5 = vmov (!%p142_p9), 0   ;;  %v766_v6 = vld [vmem:[%s1394_s1] ss:$0 sm:$0xff] (!%p142_p9)  ;;  %s943_s6 = smov (!%p142_p9), 64  }
   0xe   : > { %145 = sbr.rel (%p142_p9) target bundleno = 425 (0x1a9), region = 32  ;;  %857 = vset.pattern.permute.xlu1 (!%p142_p9), %v941_v0  ;;  %856 = vset.pattern.permute.xlu0 (!%p142_p9), %v941_v0  ;;  %p166_p10 = scmp.lt.s32.totalorder (!%p142_p9), %s764_s24, 7  ;;  %v767_v7 = vld [vmem:[%s1395_s2] ss:$0 sm:$0xff] (!%p142_p9)  ;;  %vm258_vm0 = vcmask (!%p142_p9), 523264  }
   0xf   : > { %v944_v60 = vmov (!%p142_p9), 683565275   ;;  %v945_v62 = vmov (!%p142_p9), 2475754826   ;;  %s162_s7 = sand.u32 (!%p142_p9), 1, %s931_s13   ;;  %s789_s10 = sshll.u32 (!%p142_p9), %s994_s16, 9 }
  0x10   : > { %s763_s8 = sshll.u32 (!%p142_p9), %s162_s7, 5  ;;  %s1344_s20 = scalar_lea.hbm (!%p142_p9), %s1396_s3, %s789_s10 }
  0x11   : > { %s1301_s9 = scalar_lea.vmem (!%p142_p9), [#allocation2], %s763_s8  ;;  %s1352_s16 = scalar_lea.sflag (!%p142_p9), [#allocation3], %s162_s7 }
  0x12   : > { %s697_s11 = sshll.u32 (!%p142_p9), %s1301_s9, 4  ;;  %s1346_s11 = int_to_ptr.vmem [resolvable:$true] %s697_s11 }
  0x15   : > { %s1408_s24 = smov (!%p166_p10, %s764_s24), 7 }
  0x16   : > { %s765_s25 = sshll.u32 %s1408_s24, 3  ;;  %s877_s24 = scalar_lea.vmem %s1346_s11, 512 }
  0x17   : > { %s169_s28 = scalar_lea.vmem %s1393_s0, %s765_s25  ;;  %p878_p11 = scmp.ne.s32.totalorder %s1346_s11, %s877_s24 }
  0x18   : > { %v176_v1 = vld [vmem:[%s169_s28 + $0x10] sm:$0xff]  ;;  %v174_v2 = vld [vmem:[%s169_s28] sm:$0xff]  ;;  %v177_v3 = vld [vmem:[%s169_s28 + $0x18] sm:$0xff]  ;;  %s950_s25 = smov [#allocation2]  }
  0x19   : > { %227 = vperm.xlu1 %857, %v176_v1   ;;  %219 = vperm.xlu0 %856, %v174_v2   ;;  %v175_v4 = vld [vmem:[%s169_s28 + $0x8] sm:$0xff]  ;;  %p879_p12 = pnand %p878_p11, %p1011_p5  ;;  %s881_s26 = sshll.u32 %s950_s25, 4  ;;  %s882_s26 = int_to_ptr.vmem [resolvable:$false] %s881_s26 }
  0x1a   : > { %s883_s27 = scalar_lea.vmem %s882_s26, 1024  ;;  %p884_p0 = scmp.lt.s32.totalorder %s1346_s11, %s882_s26 }
  0x1b   : > { %p880_p13 = pneg %p879_p12  ;;  %p885_p1 = scmp.lt.s32.totalorder %s883_s27, %s877_s24 }
  0x1d   : > { %231 = vperm.xlu1 %857, %v177_v3   ;;  %223 = vperm.xlu0 %856, %v175_v4   ;;  %p886_p2 = por %p885_p1, %p884_p0 }
  0x1f   : > { %p887_p3 = pnand %p886_p2, %p880_p13 }
  0x21   : > { %859 = vset.pattern.permute.xlu1 %v942_v5  ;;  %858 = vset.pattern.permute.xlu0 %v942_v5  ;;  %v948_v5 = vmov 920167782  }
  0x22   : > { %185 = vperm.xlu1 %859, %v175_v4   ;;  %180 = vperm.xlu0 %858, %v174_v2  }
  0x26   : > { %190 = vperm.xlu1 %859, %v176_v1   ;;  %195 = vperm.xlu0 %858, %v177_v3   ;;  %v946_v1 = vmov 2131351028   ;;  %v947_v3 = vmov 2102212464  }
  0x2a   : > { %860 = vset.pattern.permute.xlu0 %v941_v0 }
  0x98   : > { %v228_v8 = vpop.permute.xlu1 %227  ;;  %v220_v9 = vpop.permute.xlu0 %219 }
  0x99   : > { %v236_v10 = vmul.f32 %v766_v6, %v228_v8  ;;  %v234_v11 = vmul.f32 %v766_v6, %v220_v9 }
  0x9b   : > { %v238_v12 = vadd.f32 %v767_v7, %v234_v11  ;;  %v240_v15 = vadd.f32 %v767_v7, %v236_v10 }
  0x9c   : > { %v232_v13 = vpop.permute.xlu1 %231  ;;  %v224_v14 = vpop.permute.xlu0 %223 }
  0x9d   : > { %v235_v16 = vmul.f32 %v766_v6, %v224_v14  ;;  %246 = vrot.lane.b32.xlu1 %v238_v12, %s943_s6  ;;  %v237_v17 = vmul.f32 %v766_v6, %v232_v13  ;;  %v949_v12 = vmov 1326507024  }
  0x9f   : > { %v239_v18 = vadd.f32 %v767_v7, %v235_v16  ;;  %v241_v23 = vadd.f32 %v767_v7, %v237_v17 }
  0xa1   : > { %250 = vrot.lane.b32.xlu1 %v240_v15, %s943_s6  ;;  %248 = vrot.lane.b32.xlu0 %v239_v18, %s943_s6  ;;  %v186_v19 = vpop.permute.xlu1 %185  ;;  %v181_v20 = vpop.permute.xlu0 %180 }
  0xa2   : > { %v205_v21 = vmul.f32 %v766_v6, %v186_v19  ;;  %v204_v22 = vmul.f32 %v766_v6, %v181_v20 }
  0xa4   : > { %v215_v24 = vadd.f32 %v767_v7, %v205_v21  ;;  %v214_v25 = vadd.f32 %v767_v7, %v204_v22 }
  0xa5   : > { %252 = vrot.lane.b32.xlu0 %v241_v23, %s943_s6  ;;  %v191_v26 = vpop.permute.xlu1 %190  ;;  %v196_v27 = vpop.permute.xlu0 %195 }
  0xa6   : > { %v206_v28 = vmul.f32 %v766_v6, %v191_v26  ;;  %v207_v29 = vmul.f32 %v766_v6, %v196_v27 }
  0xa8   : > { %v216_v30 = vadd.f32 %v767_v7, %v206_v28  ;;  %v1031_v31 = vadd.f32 %v767_v7, %v207_v29 }
 0x10f   : > { %v247_v32 = vpop.permute.xlu1 %246 }
 0x110   : > { %v1034_v33 = vsel %vm258_vm0, %v214_v25, %v247_v32 }
 0x111   : > { %v263_v34 = vand.u32 2147483647, %v1034_v33  ;;  %v266_v35 = vand.u32 2139095040, %v1034_v33  ;;  %vm265_vm14 = vcmp.lt.s32.totalorder %v1034_v33, 0 }
 0x113   : > { %v267_v36 = vshrl.u32 %v266_v35, 23  ;;  %v251_v37 = vpop.permute.xlu1 %250  ;;  %v249_v38 = vpop.permute.xlu0 %248  ;;  %v270_v39 = vand.u32 8388607, %v263_v34  ;;  %vm1154_vm15 = vcmp.le.f32.partialorder %v263_v34, 0.7853982 }
 0x114   : > { %v1041_v40 = vsel %vm258_vm0, %v216_v30, %v251_v37  ;;  %v1045_v43 = vsel %vm258_vm0, %v215_v24, %v249_v38 }
 0x115   : > { %v768_v41 = vadd.s32 4294967169, %v267_v36  ;;  %v471_v42 = vand.u32 2147483647, %v1041_v40  ;;  %v474_v44 = vand.u32 2139095040, %v1041_v40  ;;  %v271_v46 = vor.u32 8388608, %v270_v39 }
 0x116   : > { %v370_v49 = vand.u32 2139095040, %v1045_v43  ;;  %v367_v58 = vand.u32 2147483647, %v1045_v43 }
 0x117   : > { %v273_v45 = vadd.s32 1, %v768_v41  ;;  %v475_v47 = vshrl.u32 %v474_v44, 23  ;;  %v478_v48 = vand.u32 8388607, %v471_v42  ;;  %v1051_v55 = vshll.u32 %v271_v46, 8 }
 0x118   : > { %v371_v52 = vshrl.u32 %v370_v49, 23  ;;  %v1078_v38 = vand.u32 8388607, %v367_v58 }
 0x119   : > { %vm274_vm1 = vcmp.gt.s32.totalorder %v273_v45, 0  ;;  %v776_v51 = vadd.s32 4294967169, %v475_v47  ;;  %v479_v56 = vor.u32 8388608, %v478_v48 }
 0x11a   : > { %v275_v50 = vsel %vm274_vm1, %v273_v45, 0  ;;  %v772_v0 = vadd.s32 4294967169, %v371_v52 }
 0x11b   : > { %v276_v53 = vshrl.u32 %v275_v50, 5  ;;  %v277_v54 = vand.u32 31, %v275_v50  ;;  %v481_v57 = vadd.s32 1, %v776_v51  ;;  %v1074_v37 = vshll.u32 %v479_v56, 8 }
 0x11c   : > { %v377_v48 = vadd.s32 1, %v772_v0 }
 0x11d   : > { %v278_v59 = vsub.s32 32, %v277_v54  ;;  %v280_v61 = vshll.u32 %v944_v60, %v277_v54  ;;  %v283_v63 = vshll.u32 %v945_v62, %v277_v54  ;;  %v286_v2 = vshll.u32 %v946_v1, %v277_v54 }
 0x11e   : > { %v289_v4 = vshll.u32 %v947_v3, %v277_v54  ;;  %v292_v6 = vshll.u32 %v948_v5, %v277_v54  ;;  %vm295_vm2 = vcmp.lt.s32.totalorder %v276_v53, 1  ;;  %vm296_vm3 = vcmp.lt.s32.totalorder %v276_v53, 2 }
 0x11f   : > { %v281_v7 = vshrl.u32 %v945_v62, %v278_v59  ;;  %v284_v8 = vshrl.u32 %v946_v1, %v278_v59  ;;  %v287_v9 = vshrl.u32 %v947_v3, %v278_v59  ;;  %v279_v10 = vshrl.u32 %v944_v60, %v278_v59 }
 0x120   : > { %v290_v11 = vshrl.u32 %v948_v5, %v278_v59  ;;  %v293_v13 = vshrl.u32 %v949_v12, %v278_v59  ;;  %vm297_vm4 = vcmp.lt.s32.totalorder %v276_v53, 3  ;;  %vm482_vm5 = vcmp.gt.s32.totalorder %v481_v57, 0 }
 0x121   : > { %v282_v14 = vor.u32 %v281_v7, %v280_v61  ;;  %v285_v15 = vor.u32 %v284_v8, %v283_v63  ;;  %v288_v16 = vor.u32 %v287_v9, %v286_v2  ;;  %vm298_vm6 = vcmp.lt.s32.totalorder %v276_v53, 4 }
 0x122   : > { %v291_v17 = vor.u32 %v290_v11, %v289_v4  ;;  %v294_v18 = vor.u32 %v293_v13, %v292_v6  ;;  %v483_v19 = vsel %vm482_vm5, %v481_v57, 0  ;;  %vm378_vm11 = vcmp.gt.s32.totalorder %v377_v48, 0 }
 0x123   : > { %v299_v20 = vsel %vm295_vm2, %v279_v10, %v282_v14  ;;  %v300_v21 = vsel %vm298_vm6, %v288_v16, 2102212464  ;;  %v303_v22 = vsel %vm295_vm2, %v282_v14, %v285_v15  ;;  %v307_v23 = vsel %vm295_vm2, %v285_v15, %v288_v16 }
 0x124   : > { %v301_v24 = vsel %vm297_vm4, %v285_v15, %v300_v21  ;;  %v304_v25 = vsel %vm298_vm6, %v291_v17, 920167782  ;;  %v308_v26 = vsel %vm298_vm6, %v294_v18, 1326507024  ;;  %v484_v27 = vshrl.u32 %v483_v19, 5 }
 0x125   : > { %v302_v28 = vsel %vm296_vm3, %v299_v20, %v301_v24  ;;  %v305_v29 = vsel %vm297_vm4, %v288_v16, %v304_v25  ;;  %v309_v30 = vsel %vm297_vm4, %v291_v17, %v308_v26  ;;  %v485_v32 = vand.u32 31, %v483_v19 }
 0x126   : > { %v306_v35 = vsel %vm296_vm3, %v303_v22, %v305_v29  ;;  %v310_v36 = vsel %vm296_vm3, %v307_v23, %v309_v30  ;;  %v318_v46 = vmul.u32 %v1051_v55, %v302_v28  ;;  %vm503_vm7 = vcmp.lt.s32.totalorder %v484_v27, 1 }
 0x127   : > { %v1081_v39 = vmul.u32.u64.low %v1051_v55, %v310_v36  ;;  %v1082_v41 = vmul.u32.u64.high %v1051_v55, %v310_v36, %v1081_v39  ;;  %v1085_v44 = vmul.u32.u64.low %v1051_v55, %v306_v35  ;;  %v1086_v45 = vmul.u32.u64.high %v1051_v55, %v306_v35, %v1085_v44 }
 0x128   : > { %v486_v47 = vsub.s32 32, %v485_v32  ;;  %v488_v49 = vshll.u32 %v944_v60, %v485_v32  ;;  %v491_v50 = vshll.u32 %v945_v62, %v485_v32  ;;  %v494_v51 = vshll.u32 %v946_v1, %v485_v32 }
 0x129   : > { %v497_v52 = vshll.u32 %v947_v3, %v485_v32  ;;  %v500_v57 = vshll.u32 %v948_v5, %v485_v32  ;;  %vm320_vm8 = vc.u32 %v1082_v41, %v1085_v44  ;;  %v321_v55 = vadd.s32 1, %v1086_v45 }
 0x12a   : > { %v489_v53 = vshrl.u32 %v945_v62, %v486_v47  ;;  %v492_v54 = vshrl.u32 %v946_v1, %v486_v47  ;;  %v495_v56 = vshrl.u32 %v947_v3, %v486_v47  ;;  %v498_v59 = vshrl.u32 %v948_v5, %v486_v47 }
 0x12b   : > { %vm504_vm9 = vcmp.lt.s32.totalorder %v484_v27, 2  ;;  %v501_v2 = vshrl.u32 %v949_v12, %v486_v47  ;;  %v322_v4 = vsel %vm320_vm8, %v321_v55, %v1086_v45  ;;  %v487_v6 = vshrl.u32 %v944_v60, %v486_v47  ;;  %v253_v47 = vpop.permute.xlu0 %252 }
 0x12c   : > { %v490_v61 = vor.u32 %v489_v53, %v488_v49  ;;  %v493_v63 = vor.u32 %v492_v54, %v491_v50  ;;  %v496_v0 = vor.u32 %v495_v56, %v494_v51  ;;  %v499_v7 = vor.u32 %v498_v59, %v497_v52 }
 0x12d   : > { %vm506_vm10 = vcmp.lt.s32.totalorder %v484_v27, 4  ;;  %v323_v8 = vadd.s32 %v322_v4, %v318_v46  ;;  %v502_v9 = vor.u32 %v501_v2, %v500_v57  ;;  %vm505_vm12 = vcmp.lt.s32.totalorder %v484_v27, 3 }
 0x12e   : > { %v508_v10 = vsel %vm506_vm10, %v496_v0, 2102212464  ;;  %v511_v11 = vsel %vm503_vm7, %v490_v61, %v493_v63  ;;  %v512_v13 = vsel %vm506_vm10, %v499_v7, 920167782  ;;  %v515_v14 = vsel %vm503_vm7, %v493_v63, %v496_v0 }
 0x12f   : > { %v324_v15 = vadd.s32 536870912, %v323_v8  ;;  %v507_v16 = vsel %vm503_vm7, %v487_v6, %v490_v61  ;;  %v513_v17 = vsel %vm505_vm12, %v496_v0, %v512_v13  ;;  %v516_v18 = vsel %vm506_vm10, %v502_v9, 1326507024 }
 0x130   : > { %v509_v19 = vsel %vm505_vm12, %v493_v63, %v508_v10  ;;  %v514_v20 = vsel %vm504_vm9, %v511_v11, %v513_v17  ;;  %v517_v21 = vsel %vm505_vm12, %v499_v7, %v516_v18  ;;  %v379_v22 = vsel %vm378_vm11, %v377_v48, 0 }
 0x131   : > { %v325_v23 = vshrl.u32 %v324_v15, 30  ;;  %v518_v24 = vsel %vm504_vm9, %v515_v14, %v517_v21  ;;  %v1111_v25 = vmul.u32.u64.low %v1074_v37, %v514_v20  ;;  %v1112_v26 = vmul.u32.u64.high %v1074_v37, %v514_v20, %v1111_v25 }
 0x132   : > { %v1116_v28 = vmul.u32.u64.low %v1074_v37, %v518_v24  ;;  %v1117_v29 = vmul.u32.u64.high %v1074_v37, %v518_v24, %v1116_v28  ;;  %v381_v30 = vand.u32 31, %v379_v22  ;;  %v510_v35 = vsel %vm504_vm9, %v507_v16, %v509_v19 }
 0x133   : > { %v326_v32 = vshll.u32 %v325_v23, 30  ;;  %v375_v36 = vor.u32 8388608, %v1078_v38  ;;  %v529_v46 = vadd.s32 1, %v1112_v26  ;;  %v526_v48 = vmul.u32 %v1074_v37, %v510_v35 }
 0x134   : > { %v382_v39 = vsub.s32 32, %v381_v30  ;;  %vm528_vm13 = vc.u32 %v1117_v29, %v1111_v25  ;;  %v1135_v52 = vsel %vm258_vm0, %v1031_v31, %v253_v47  ;;  %v393_v56 = vshll.u32 %v947_v3, %v381_v30 }
 0x135   : > { %v1121_v45 = vsub.s32 %v323_v8, %v326_v32  ;;  %v530_v27 = vsel %vm528_vm13, %v529_v46, %v1112_v26  ;;  %v1131_v51 = vshll.u32 %v375_v36, 8  ;;  %v349_v57 = vsub.s32 4, %v325_v23 }
 0x136   : > { %v531_v50 = vadd.s32 %v530_v27, %v526_v48  ;;  %v394_v38 = vshrl.u32 %v948_v5, %v382_v39  ;;  %v385_v53 = vshrl.u32 %v945_v62, %v382_v39  ;;  %v388_v54 = vshrl.u32 %v946_v1, %v382_v39 }
 0x137   : > { %v329_v49 = vsub.s32 0, %v1121_v45  ;;  %v1141_v59 = vshrl.u32 %v379_v22, 5  ;;  %v391_v61 = vshrl.u32 %v947_v3, %v382_v39  ;;  %v384_v0 = vshll.u32 %v944_v60, %v381_v30 }
 0x138   : > { %v532_v55 = vadd.s32 536870912, %v531_v50  ;;  %v387_v31 = vshll.u32 %v945_v62, %v381_v30  ;;  %v395_v2 = vor.u32 %v394_v38, %v393_v56  ;;  %v319_v4 = vadd.s32 %v1085_v44, %v1082_v41 }
 0x139   : > { %v769_v37 = vmin.u32 %v329_v49, %v1121_v45  ;;  %v390_v7 = vshll.u32 %v946_v1, %v381_v30  ;;  %v397_v8 = vshrl.u32 %v949_v12, %v382_v39  ;;  %v386_v11 = vor.u32 %v385_v53, %v384_v0 }
 0x13a   : > { %v1148_v6 = vshrl.u32 %v532_v55, 30  ;;  %v389_v13 = vor.u32 %v388_v54, %v387_v31  ;;  %v396_v14 = vshll.u32 %v948_v5, %v381_v30  ;;  %vm402_vm0 = vcmp.lt.s32.totalorder %v1141_v59, 4 }
 0x13b   : > { %v331_v63 = vclz %v769_v37  ;;  %v392_v41 = vor.u32 %v391_v61, %v390_v7  ;;  %v578_v44 = vand.u32 2139095040, %v1135_v52  ;;  %v350_v16 = vsel %vm265_vm14, %v349_v57, %v325_v23 }
 0x13c   : > { %v534_v15 = vshll.u32 %v1148_v6, 30  ;;  %v398_v34 = vor.u32 %v397_v8, %v396_v14  ;;  %v408_v17 = vsel %vm402_vm0, %v395_v2, 920167782  ;;  %v383_v20 = vshrl.u32 %v944_v60, %v382_v39 }
 0x13d   : > { %v770_v10 = vadd.s32 4294967294, %v331_v63  ;;  %vm399_vm2 = vcmp.lt.s32.totalorder %v1141_v59, 1  ;;  %vm401_vm3 = vcmp.lt.s32.totalorder %v1141_v59, 3  ;;  %vm400_vm4 = vcmp.lt.s32.totalorder %v1141_v59, 2 }
 0x13e   : > { %v1166_v19 = vsub.s32 %v531_v50, %v534_v15  ;;  %v407_v24 = vsel %vm399_vm2, %v386_v11, %v389_v13  ;;  %v409_v26 = vsel %vm401_vm3, %v392_v41, %v408_v17  ;;  %v411_v28 = vsel %vm399_vm2, %v389_v13, %v392_v41 }
 0x13f   : > { %vm771_vm1 = vcmp.lt.s32.totalorder %v770_v10, 0  ;;  %vm473_vm5 = vcmp.lt.s32.totalorder %v1041_v40, 0  ;;  %v412_v36 = vsel %vm402_vm0, %v398_v34, 1326507024  ;;  %v404_v46 = vsel %vm402_vm0, %v392_v41, 2102212464 }
 0x140   : > { %v334_v18 = vsel %vm771_vm1, 0, %v770_v10  ;;  %v537_v23 = vsub.s32 0, %v1166_v19  ;;  %v410_v47 = vsel %vm400_vm4, %v407_v24, %v409_v26  ;;  %v413_v48 = vsel %vm401_vm3, %v395_v2, %v412_v36 }
 0x141   : > { %v335_v21 = vsub.s32 32, %v334_v18  ;;  %v339_v22 = vsub.s32 4294967266, %v334_v18  ;;  %v336_v30 = vshll.u32 %v1121_v45, %v334_v18  ;;  %v414_v27 = vsel %vm400_vm4, %v411_v28, %v413_v48 }
 0x142   : > { %v777_v39 = vmin.u32 %v537_v23, %v1166_v19  ;;  %v579_v50 = vshrl.u32 %v578_v44, 23  ;;  %v352_v38 = vsel %vm1154_vm15, 0, %v350_v16  ;;  %v557_v53 = vsub.s32 4, %v1148_v6 }
 0x143   : > { %v337_v32 = vshrl.u32 %v319_v4, %v335_v21  ;;  %v340_v35 = vadd.s32 127, %v339_v22  ;;  %v403_v54 = vsel %vm399_vm2, %v383_v20, %v386_v11  ;;  %v405_v57 = vsel %vm401_vm3, %v389_v13, %v404_v46 }
 0x144   : > { %v539_v37 = vclz %v777_v39  ;;  %v1200_v55 = vmul.u32.u64.low %v1131_v51, %v414_v27  ;;  %v1201_v61 = vmul.u32.u64.high %v1131_v51, %v414_v27, %v1200_v55  ;;  %v780_v2 = vadd.s32 4294967169, %v579_v50 }
 0x145   : > { %v338_v49 = vor.u32 %v337_v32, %v336_v30  ;;  %v341_v45 = vshll.u32 %v340_v35, 23  ;;  %v1204_v0 = vmul.u32.u64.low %v1131_v51, %v410_v47  ;;  %v1205_v31 = vmul.u32.u64.high %v1131_v51, %v410_v47, %v1204_v0 }
 0x146   : > { %v778_v63 = vadd.s32 4294967294, %v539_v37  ;;  %vm1210_vm6 = vcmp.le.f32.partialorder %v471_v42, 0.7853982  ;;  %v575_v10 = vand.u32 2147483647, %v1135_v52  ;;  %v527_v11 = vadd.s32 %v1111_v25, %v1117_v29 }
 0x147   : > { %v342_v56 = vor.u32 4788187, %v341_v45  ;;  %v345_v7 = vcvt.s32.f32 %v338_v49  ;;  %v406_v13 = vsel %vm400_vm4, %v403_v54, %v405_v57  ;;  %v585_v14 = vadd.s32 1, %v780_v2 }
 0x148   : > { %vm779_vm7 = vcmp.lt.s32.totalorder %v778_v63, 0  ;;  %v356_v41 = vadd.s32 3, %v352_v38  ;;  %vm424_vm8 = vc.u32 %v1201_v61, %v1204_v0  ;;  %v558_v34 = vsel %vm473_vm5, %v557_v53, %v1148_v6 }
 0x149   : > { %v343_v4 = vand.u32 2147483647, %v342_v56  ;;  %v542_v44 = vsel %vm779_vm7, 0, %v778_v63  ;;  %v425_v17 = vadd.s32 1, %v1205_v31  ;;  %v422_v59 = vmul.u32 %v1131_v51, %v406_v13 }
 0x14a   : > { %v543_v42 = vsub.s32 32, %v542_v44  ;;  %v547_v16 = vsub.s32 4294967266, %v542_v44  ;;  %v544_v29 = vshll.u32 %v1166_v19, %v542_v44  ;;  %vm586_vm9 = vcmp.gt.s32.totalorder %v585_v14, 0 }
 0x14b   : > { %v346_v15 = vmul.f32 %v345_v7, %v343_v4  ;;  %v426_v21 = vsel %vm424_vm8, %v425_v17, %v1205_v31  ;;  %v587_v22 = vsel %vm586_vm9, %v585_v14, 0  ;;  %v1230_v23 = vand.u32 3, %v356_v41 }
 0x14c   : > { %v545_v18 = vshrl.u32 %v527_v11, %v543_v42  ;;  %v548_v20 = vadd.s32 127, %v547_v16  ;;  %v427_v26 = vadd.s32 %v426_v21, %v422_v59  ;;  %v589_v6 = vand.u32 31, %v587_v22 }
 0x14d   : > { %v347_v25 = vxor.u32 2147483648, %v346_v15  ;;  %v560_v51 = vsel %vm1210_vm6, 0, %v558_v34  ;;  %v582_v35 = vand.u32 8388607, %v575_v10  ;;  %vm362_vm10 = vcmp.eq.s32.totalorder %v1230_v23, 2 }
 0x14e   : > { %v546_v19 = vor.u32 %v545_v18, %v544_v29  ;;  %v549_v30 = vshll.u32 %v548_v20, 23  ;;  %v428_v32 = vadd.s32 536870912, %v427_v26  ;;  %v590_v36 = vsub.s32 32, %v589_v6 }
 0x14f   : > { %v348_v24 = vsel %vm265_vm14, %v347_v25, %v346_v15  ;;  %v1241_v49 = vadd.s32 3, %v560_v51  ;;  %v583_v45 = vor.u32 8388608, %v582_v35  ;;  %vm359_vm11 = vcmp.eq.s32.totalorder %v1230_v23, 0 }
 0x150   : > { %v351_v28 = vsel %vm1154_vm15, %v1034_v33, %v348_v24  ;;  %v550_v39 = vor.u32 4788187, %v549_v30  ;;  %v1239_v46 = vshrl.u32 %v428_v32, 30  ;;  %v553_v48 = vcvt.s32.f32 %v546_v19 }
 0x151   : > { %861 = vcosq.f32 %v351_v28  ;;  %v593_v27 = vshrl.u32 %v945_v62, %v590_v36  ;;  %v596_v50 = vshrl.u32 %v946_v1, %v590_v36  ;;  %v599_v37 = vshrl.u32 %v947_v3, %v590_v36 }
 0x152   : > { %863 = vsinq.f32 %v351_v28  ;;  %v551_v47 = vand.u32 2147483647, %v550_v39  ;;  %v430_v9 = vshll.u32 %v1239_v46, 30  ;;  %v601_v53 = vshll.u32 %v947_v3, %v589_v6 }
 0x153   : > { %v602_v54 = vshrl.u32 %v948_v5, %v590_v36  ;;  %vm358_vm12 = vcmp.lt.s32.totalorder %v1230_v23, 2  ;;  %v1254_v57 = vshrl.u32 %v587_v22, 5  ;;  %v592_v55 = vshll.u32 %v944_v60, %v589_v6 }
 0x154   : > { %v554_v38 = vmul.f32 %v553_v48, %v551_v47  ;;  %v1252_v56 = vsub.s32 %v427_v26, %v430_v9  ;;  %v595_v63 = vshll.u32 %v945_v62, %v589_v6  ;;  %vm355_vm13 = vweird.f32 %v1034_v33 }
 0x155   : > { %v598_v2 = vshll.u32 %v946_v1, %v589_v6  ;;  %v603_v4 = vor.u32 %v602_v54, %v601_v53  ;;  %v605_v3 = vshrl.u32 %v949_v12, %v590_v36  ;;  %v594_v11 = vor.u32 %v593_v27, %v592_v55 }
 0x156   : > { %v555_v31 = vxor.u32 2147483648, %v554_v38  ;;  %v433_v7 = vsub.s32 0, %v1252_v56  ;;  %v597_v13 = vor.u32 %v596_v50, %v595_v63  ;;  %v1263_v14 = vshll.u32 %v583_v45, 8 }
 0x157   : > { %v591_v62 = vshrl.u32 %v944_v60, %v590_v36  ;;  %v600_v41 = vor.u32 %v599_v37, %v598_v2  ;;  %v604_v44 = vshll.u32 %v948_v5, %v589_v6  ;;  %vm607_vm14 = vcmp.lt.s32.totalorder %v1254_v57, 1 }
 0x158   : > { %v556_v15 = vsel %vm473_vm5, %v555_v31, %v554_v38  ;;  %v773_v42 = vmin.u32 %v433_v7, %v1252_v56  ;;  %vm610_vm15 = vcmp.lt.s32.totalorder %v1254_v57, 4  ;;  %v615_v8 = vsel %vm607_vm14, %v594_v11, %v597_v13 }
 0x159   : > { %v559_v12 = vsel %vm1210_vm6, %v1041_v40, %v556_v15  ;;  %v606_v60 = vor.u32 %v605_v3, %v604_v44  ;;  %v616_v5 = vsel %vm610_vm15, %v603_v4, 920167782  ;;  %vm608_vm0 = vcmp.lt.s32.totalorder %v1254_v57, 2 }
 0x15a   : > { %865 = vcosq.f32 %v559_v12  ;;  %v435_v25 = vclz %v773_v42  ;;  %vm609_vm1 = vcmp.lt.s32.totalorder %v1254_v57, 3  ;;  %v612_v59 = vsel %vm610_vm15, %v600_v41, 2102212464 }
 0x15b   : > { %v862_v1 = vpop.eup %861  ;;  %867 = vsinq.f32 %v559_v12  ;;  %v617_v21 = vsel %vm609_vm1, %v600_v41, %v616_v5  ;;  %v619_v22 = vsel %vm607_vm14, %v597_v13, %v600_v41  ;;  %v611_v26 = vsel %vm607_vm14, %v591_v62, %v594_v11 }
 0x15c   : > { %v864_v16 = vpop.eup %863  ;;  %v363_v34 = vxor.u32 2147483648, %v862_v1  ;;  %v774_v20 = vadd.s32 4294967294, %v435_v25  ;;  %v618_v6 = vsel %vm608_vm0, %v615_v8, %v617_v21  ;;  %v620_v28 = vsel %vm610_vm15, %v606_v60, 1326507024 }
 0x15d   : > { %v360_v17 = vxor.u32 2147483648, %v864_v16  ;;  %v613_v30 = vsel %vm609_vm1, %v597_v13, %v612_v59  ;;  %v621_v51 = vsel %vm609_vm1, %v603_v4, %v620_v28  ;;  %v423_v39 = vadd.s32 %v1204_v0, %v1201_v61 }
 0x15e   : > { %v364_v29 = vsel %vm362_vm10, %v363_v34, %v864_v16  ;;  %vm775_vm2 = vcmp.lt.s32.totalorder %v774_v20, 0  ;;  %v622_v32 = vsel %vm608_vm0, %v619_v22, %v621_v51  ;;  %v565_v48 = vand.u32 3, %v1241_v49 }
 0x15f   : > { %v361_v18 = vsel %vm359_vm11, %v862_v1, %v360_v17  ;;  %v438_v23 = vsel %vm775_vm2, 0, %v774_v20  ;;  %v1307_v35 = vmul.u32.u64.low %v1263_v14, %v618_v6  ;;  %v1308_v36 = vmul.u32.u64.high %v1263_v14, %v618_v6, %v1307_v35 }
 0x160   : > { %v365_v24 = vsel %vm358_vm12, %v361_v18, %v364_v29  ;;  %v439_v33 = vsub.s32 32, %v438_v23  ;;  %v443_v47 = vsub.s32 4294967266, %v438_v23  ;;  %v440_v27 = vshll.u32 %v1252_v56, %v438_v23 }
 0x161   : > { %v366_v19 = vsel %vm355_vm13, nan, %v365_v24  ;;  %v1314_v9 = vmul.u32.u64.low %v1263_v14, %v622_v32  ;;  %v1315_v45 = vmul.u32.u64.high %v1263_v14, %v622_v32, %v1314_v9  ;;  %v614_v37 = vsel %vm608_vm0, %v611_v26, %v613_v30 }
 0x162   : > { %679 = vst [vmem:[%s1301_s9] sm:$0xff] %v366_v19  ;;  %v441_v50 = vshrl.u32 %v423_v39, %v439_v33  ;;  %v444_v38 = vadd.s32 127, %v443_v47  ;;  %v633_v54 = vadd.s32 1, %v1308_v36  ;;  %vm570_vm3 = vcmp.eq.s32.totalorder %v565_v48, 2 }
 0x163   : > { %v630_v49 = vmul.u32 %v1263_v14, %v614_v37  ;;  %vm632_vm4 = vc.u32 %v1315_v45, %v1307_v35  ;;  %vm567_vm5 = vcmp.eq.s32.totalorder %v565_v48, 0  ;;  %vm566_vm6 = vcmp.lt.s32.totalorder %v565_v48, 2 }
 0x164   : > { %v866_v53 = vpop.eup %865  ;;  %v442_v0 = vor.u32 %v441_v50, %v440_v27  ;;  %v445_v63 = vshll.u32 %v444_v38, 23  ;;  %v634_v57 = vsel %vm632_vm4, %v633_v54, %v1308_v36  ;;  %vm563_vm7 = vweird.f32 %v1041_v40 }
 0x165   : > { %v868_v55 = vpop.eup %867  ;;  %v571_v61 = vxor.u32 2147483648, %v866_v53  ;;  %v635_v3 = vadd.s32 %v634_v57, %v630_v49  ;;  %v453_v14 = vsub.s32 4, %v1239_v46  ;;  %vm369_vm8 = vcmp.lt.s32.totalorder %v1045_v43, 0 }
 0x166   : > { %v568_v31 = vxor.u32 2147483648, %v868_v55  ;;  %v446_v2 = vor.u32 4788187, %v445_v63  ;;  %v449_v13 = vcvt.s32.f32 %v442_v0  ;;  %vm368_vm9 = vcmp.le.f32.partialorder %v367_v58, 0.7853982 }
 0x167   : > { %v572_v56 = vsel %vm570_vm3, %v571_v61, %v868_v55  ;;  %v636_v62 = vadd.s32 536870912, %v635_v3  ;;  %v454_v40 = vsel %vm369_vm8, %v453_v14, %v1239_v46  ;;  %v631_v22 = vadd.s32 %v1307_v35, %v1315_v45 }
 0x168   : > { %v569_v4 = vsel %vm567_vm5, %v866_v53, %v568_v31  ;;  %v447_v11 = vand.u32 2147483647, %v446_v2  ;;  %v456_v60 = vsel %vm368_vm9, 0, %v454_v40  ;;  %vm459_vm14 = vweird.f32 %v1045_v43 }
 0x169   : > { %v573_v7 = vsel %vm566_vm6, %v569_v4, %v572_v56  ;;  %v637_v44 = vshrl.u32 %v636_v62, 30  ;;  %v460_v25 = vadd.s32 3, %v456_v60  ;;  %vm577_vm15 = vcmp.lt.s32.totalorder %v1135_v52, 0 }
 0x16a   : > { %v574_v15 = vsel %vm563_vm7, nan, %v573_v7  ;;  %v450_v41 = vmul.f32 %v449_v13, %v447_v11  ;;  %vm576_vm0 = vcmp.le.f32.partialorder %v575_v10, 0.7853982  ;;  %vm667_vm4 = vweird.f32 %v1135_v52 }
 0x16b   : > { %681 = vst [vmem:[%s1301_s9 + $0x10] sm:$0xff] %v574_v15  ;;  %v638_v12 = vshll.u32 %v637_v44, 30  ;;  %v461_v59 = vand.u32 3, %v460_v25  ;;  %v661_v9 = vsub.s32 4, %v637_v44 }
 0x16c   : > { %v451_v1 = vxor.u32 2147483648, %v450_v41 }
 0x16d   : > { %v639_v34 = vsub.s32 %v635_v3, %v638_v12  ;;  %vm463_vm11 = vcmp.eq.s32.totalorder %v461_v59, 0  ;;  %vm466_vm12 = vcmp.eq.s32.totalorder %v461_v59, 2  ;;  %vm462_vm13 = vcmp.lt.s32.totalorder %v461_v59, 2 }
 0x16e   : > { %v452_v42 = vsel %vm369_vm8, %v451_v1, %v450_v41 }
 0x16f   : > { %v455_v16 = vsel %vm368_vm9, %v1045_v43, %v452_v42  ;;  %v641_v5 = vsub.s32 0, %v639_v34  ;;  %v662_v43 = vsel %vm577_vm15, %v661_v9, %v637_v44 }
 0x170   : > { %869 = vcosq.f32 %v455_v16  ;;  %v664_v38 = vsel %vm576_vm0, 0, %v662_v43 }
 0x171   : > { %871 = vsinq.f32 %v455_v16  ;;  %v781_v17 = vmin.u32 %v641_v5, %v639_v34  ;;  %v668_v37 = vadd.s32 3, %v664_v38 }
 0x173   : > { %v643_v8 = vclz %v781_v17  ;;  %v669_v53 = vand.u32 3, %v668_v37 }
 0x175   : > { %v782_v29 = vadd.s32 4294967294, %v643_v8  ;;  %vm674_vm1 = vcmp.eq.s32.totalorder %v669_v53, 2  ;;  %vm671_vm2 = vcmp.eq.s32.totalorder %v669_v53, 0  ;;  %vm670_vm3 = vcmp.lt.s32.totalorder %v669_v53, 2 }
 0x177   : > { %vm783_vm10 = vcmp.lt.s32.totalorder %v782_v29, 0 }
 0x178   : > { %v646_v20 = vsel %vm783_vm10, 0, %v782_v29 }
 0x179   : > { %v647_v46 = vsub.s32 32, %v646_v20  ;;  %v651_v24 = vsub.s32 4294967266, %v646_v20  ;;  %v648_v28 = vshll.u32 %v639_v34, %v646_v20 }
 0x17a   : > { %v870_v18 = vpop.eup %869 }
 0x17b   : > { %v872_v21 = vpop.eup %871  ;;  %v467_v58 = vxor.u32 2147483648, %v870_v18  ;;  %v649_v19 = vshrl.u32 %v631_v22, %v647_v46  ;;  %v652_v30 = vadd.s32 127, %v651_v24 }
 0x17c   : > { %v464_v26 = vxor.u32 2147483648, %v872_v21 }
 0x17d   : > { %v468_v6 = vsel %vm466_vm12, %v467_v58, %v872_v21  ;;  %v650_v32 = vor.u32 %v649_v19, %v648_v28  ;;  %v653_v36 = vshll.u32 %v652_v30, 23 }
 0x17e   : > { %v465_v51 = vsel %vm463_vm11, %v870_v18, %v464_v26 }
 0x17f   : > { %v469_v23 = vsel %vm462_vm13, %v465_v51, %v468_v6  ;;  %v654_v35 = vor.u32 4788187, %v653_v36  ;;  %v657_v47 = vcvt.s32.f32 %v650_v32 }
 0x180   : > { %v470_v39 = vsel %vm459_vm14, nan, %v469_v23 }
 0x181   : > { %680 = vst [vmem:[%s1301_s9 + $0x8] sm:$0xff] %v470_v39  ;;  %v655_v33 = vand.u32 2147483647, %v654_v35 }
 0x183   : > { %v658_v48 = vmul.f32 %v657_v47, %v655_v33 }
 0x185   : > { %v659_v45 = vxor.u32 2147483648, %v658_v48 }
 0x187   : > { %v660_v27 = vsel %vm577_vm15, %v659_v45, %v658_v48 }
 0x188   : > { %v663_v50 = vsel %vm576_vm0, %v1135_v52, %v660_v27 }
 0x189   : > { %873 = vcosq.f32 %v663_v50 }
 0x18a   : > { %875 = vsinq.f32 %v663_v50 }
 0x193   : > { %v874_v54 = vpop.eup %873 }
 0x194   : > { %v876_v55 = vpop.eup %875  ;;  %v675_v61 = vxor.u32 2147483648, %v874_v54 }
 0x195   : > { %v672_v0 = vxor.u32 2147483648, %v876_v55 }
 0x196   : > { %v676_v10 = vsel %vm674_vm1, %v675_v61, %v876_v55 }
 0x197   : > { %v673_v63 = vsel %vm671_vm2, %v874_v54, %v672_v0 }
 0x198   : > { %v677_v31 = vsel %vm670_vm3, %v673_v63, %v676_v10 }
 0x199   : > { %v678_v49 = vsel %vm667_vm4, nan, %v677_v31 }
 0x19a   : > { %682 = vst [vmem:[%s1301_s9 + $0x18] sm:$0xff] %v678_v49 }
 0x19b   : > { %890 = shalt.err (!%p887_p3)
}
 0x19c   : > { %s891_s28 = scalar_lea.hbm %s1344_s20, 512  ;;  %s895_s4 = scalar_lea.hbm %s1396_s3, 1024 }
 0x19d   : > { %p892_p4 = scmp.ne.s32.totalorder %s1344_s20, %s891_s28  ;;  %p896_p9 = scmp.lt.u32.totalorder %s1344_s20, %s1396_s3 }
 0x19e   : > { %p897_p10 = scmp.lt.u32.totalorder %s895_s4, %s891_s28  ;;  %p899_p12 = scmp.lt.u32.totalorder %s891_s28, %s1344_s20 }
 0x19f   : > { %p893_p7 = pnand %p892_p4, %p1011_p5 }
 0x1a0   : > { %p898_p11 = por %p897_p10, %p896_p9 }
 0x1a1   : > { %p894_p8 = pneg %p893_p7 }
 0x1a2   : > { %p900_p13 = por %p899_p12, %p898_p11 }
 0x1a4   : > { %p901_p0 = pnand %p900_p13, %p894_p8 }
 0x1a6   : > { %904 = shalt.err (!%p901_p0)
}
 0x1a7   : > { %s951_s7 = smov 128   ;;  %s952_s8 = smov 8  }
 0x1a8   : > { %806 = dma.vmem_to_hbm [thread:$0]  (%p1011_p5), %s1346_s11, 512, %s1344_s20, %s1352_s16, %s951_s7, %s951_s7, %s952_s8  }
 0x1a9 PF: > { %p812_p1 = scmp.ge.s32.totalorder %s939_s15, 2  ;;  %s712_s9 = sand.u32 1, %s927_s12  }
 0x1aa   : > { %s713_s10 = scalar_lea.sflag [#allocation3], %s712_s9 }
 0x1ab   : > { %p809_p2 = pnand %p812_p1, %p1015_p6 }
 0x1ad   : > { %922 = dma.done.wait (!%p809_p2), %s713_s10, 512  }
 0x1ae   : > { %924 = vsyncadd (!%p809_p2), %s713_s10, 4294966784  ;;  %p13_p3 = scmp.ge.s32.totalorder %s998_s18, 4   ;;  %s1403_s12 = smov %s931_s13 }
 0x1af   : > { %s1404_s13 = smov %s935_s14  ;;  %s1405_s14 = smov %s1009_s21 }
 0x1b0   : > { %s1406_s15 = smov %s998_s18  ;;  %15 = sbr.rel (!%p13_p3) target bundleno = 3 (0x3), region = 67 }
 0x1b7   :  { %718 = vsyncpa [#allocation3], 1 }
 0x1b8   :  { %720 = vsyncpa [#allocation3 + $0x1], 1 }

</bundles_post_ra>
